<compile_context>
chip_gen: v5e
topology: v5e:2x2
jax: 0.10.0
libtpu: 0.0.40
codegen_flags: <defaults>
</compile_context>

<pallas_src>
import functools

import jax
import jax.numpy as jnp
from jax.experimental import pallas as pl
from jax.experimental.pallas import tpu as pltpu

_LANE = 128


def _round_up(x, m):
    return ((x + m - 1) // m) * m


def _query_vmem_capacity():
    try:
        info = pltpu.get_tpu_info()
        v = getattr(info, "vmem_capacity_bytes", None)
        if v:
            return int(v)
    except Exception:
        pass
    return 64 * 1024 * 1024  # conservative (v7x-like) default


_VMEM_CAPACITY = _query_vmem_capacity()
# Heuristic: 64 MiB/TC chips (v7x) have 2 TensorCores sharded via "parallel".
_NUM_TC = 2 if _VMEM_CAPACITY <= 64 * 1024 * 1024 else 1

if _VMEM_CAPACITY >= 100 * 1024 * 1024:          # v5e / v6e: 128 MiB VMEM
    _VMEM_LIMIT_BYTES = 96 * 1024 * 1024
    _VMEM_BUDGET_BYTES = 80 * 1024 * 1024
    _WEIGHT_RESIDENT_BUDGET = 64 * 1024 * 1024
else:                                            # v7x: 64 MiB per TensorCore
    _VMEM_LIMIT_BYTES = 48 * 1024 * 1024
    _VMEM_BUDGET_BYTES = 40 * 1024 * 1024
    _WEIGHT_RESIDENT_BUDGET = 24 * 1024 * 1024


def _apply_activation(y, activation):
    if activation is None:
        return y
    if activation == "relu":
        return jnp.maximum(y, 0.0)
    if activation == "tanh":
        return jnp.tanh(y)
    if activation == "sigmoid":
        return jax.nn.sigmoid(y)
    raise ValueError(f"Unsupported activation '{activation}'")


def _mlp_reference(x, params, activation):
    """Plain-XLA reference / tiny-problem fallback."""
    h = x
    for i, (w, b) in enumerate(params):
        h = h @ w + b
        if i != len(params) - 1:
            h = _apply_activation(h, activation)
    return h


def _resident_spec(block_shape):
    """BlockSpec for a grid-invariant operand: VMEM-resident, single-buffered."""
    zeros = (0,) * len(block_shape)
    index_map = lambda *args: zeros
    try:
        return pl.BlockSpec(block_shape, index_map, pipeline_mode=pl.Buffered(1))
    except (TypeError, ValueError, AttributeError):
        return pl.BlockSpec(block_shape, index_map)


def _streamed_spec(block_shape, index_map, buffer_count=2):
    if buffer_count != 2:
        try:
            return pl.BlockSpec(block_shape, index_map,
                                pipeline_mode=pl.Buffered(buffer_count))
        except (TypeError, ValueError, AttributeError):
            pass
    return pl.BlockSpec(block_shape, index_map)


def _pick_tile_multiple(dim_padded, preferred, align=_LANE):
    """dim_padded is a positive multiple of `align`; return the largest multiple
    of `align` <= preferred that divides dim_padded (at least `align`)."""
    if dim_padded <= preferred:
        return dim_padded
    t = max((preferred // align) * align, align)
    while t > align and dim_padded % t:
        t -= align
    return t


# ---------------------------------------------------------------------------
# Path 1: whole-MLP fused kernel (weights VMEM-resident, no HBM intermediates)
# ---------------------------------------------------------------------------
def _make_fused_mlp_kernel(n_layers, activation, compute_dtype):
    def kernel(*refs):
        x_ref = refs[0]
        w_refs = refs[1:1 + n_layers]
        b_refs = refs[1 + n_layers:1 + 2 * n_layers]
        o_ref = refs[1 + 2 * n_layers]

        h = x_ref[...]
        for idx in range(n_layers):
            lhs = h.astype(compute_dtype)
            rhs = w_refs[idx][...]
            y = jnp.dot(lhs, rhs, preferred_element_type=jnp.float32)
            y = y + b_refs[idx][...]
            if idx != n_layers - 1:
                y = _apply_activation(y, activation)
            h = y
        o_ref[...] = h.astype(o_ref.dtype)

    return kernel


def mlp_fused_pallas(x, params, activation="relu",
                     compute_dtype=jnp.bfloat16, out_dtype=None):
    """Whole-MLP forward in one pallas_call; all weights stay VMEM-resident.

    Every layer output width is zero-padded up to a multiple of 128 lanes; the
    final output is sliced back to the true width in the wrapper."""
    M, K0 = x.shape
    n_layers = len(params)
    out_dtype = out_dtype or x.dtype
    compute_dtype = jnp.dtype(compute_dtype)
    act_bytes = compute_dtype.itemsize
    out_bytes = jnp.dtype(out_dtype).itemsize
    row_align = 16 if act_bytes < 4 else 8

    # Pad each layer's output width (and the next layer's input rows) to 128.
    widths = [K0] + [w.shape[1] for (w, _) in params]
    widths_pad = [K0] + [_round_up(n, _LANE) for n in widths[1:]]
    ws, bs = [], []
    for i, (w, b) in enumerate(params):
        in_p, out_p = widths_pad[i], widths_pad[i + 1]
        wp = w.astype(compute_dtype)
        if wp.shape != (in_p, out_p):
            wp = jnp.pad(wp, ((0, in_p - wp.shape[0]), (0, out_p - wp.shape[1])))
        bp = b.astype(jnp.float32)
        if bp.shape[0] != out_p:
            bp = jnp.pad(bp, (0, out_p - bp.shape[0]))
        ws.append(wp)
        bs.append(bp.reshape(1, out_p))

    n_out, n_out_pad = widths[-1], widths_pad[-1]
    x_in = x.astype(compute_dtype)
    resident = sum(w.size * act_bytes for w in ws) + sum(b.size * 4 for b in bs)

    # Largest M tile (<=512, multiple of row_align) that keeps resident weights
    # + double-buffered I/O + two consecutive f32 intermediates inside budget.
    # TODO(synk): for very wide hidden layers the intermediates could instead be
    #             computed in N-chunks inside the kernel to bound vreg pressure.
    pair = max(widths_pad[i] + widths_pad[i + 1] for i in range(n_layers))

    def _fits(tm_):
        x_io = 2 * tm_ * widths_pad[0] * act_bytes
        o_io = 2 * tm_ * n_out_pad * out_bytes
        live = 2 * tm_ * pair * 4                 # f32 intermediates + spill
        return resident + x_io + o_io + live <= _VMEM_BUDGET_BYTES

    tm = min(512, M)
    if tm < M:
        tm = max(row_align, (tm // row_align) * row_align)
    while tm > row_align and not _fits(tm):
        tm = max(row_align, tm // 2)
    # Keep both TensorCores busy on dual-core chips.
    if _NUM_TC > 1 and M >= 2 * row_align and pl.cdiv(M, tm) < _NUM_TC:
        tm = min(tm, _round_up(pl.cdiv(M, _NUM_TC), row_align))
    tm = min(tm, M)

    grid = (pl.cdiv(M, tm),)

    in_specs = [pl.BlockSpec((tm, widths_pad[0]), lambda i: (i, 0))]
    in_specs += [_resident_spec(w.shape) for w in ws]
    in_specs += [_resident_spec(b.shape) for b in bs]

    flops = sum(2 * M * a * b for a, b in zip(widths_pad[:-1], widths_pad[1:]))
    transc = 0 if activation in (None, "relu") else M * sum(widths_pad[1:-1])
    bytes_acc = x_in.size * act_bytes + resident + M * n_out_pad * out_bytes

    out = pl.pallas_call(
        _make_fused_mlp_kernel(n_layers, activation, compute_dtype),
        out_shape=jax.ShapeDtypeStruct((M, n_out_pad), out_dtype),
        grid_spec=pltpu.PrefetchScalarGridSpec(
            num_scalar_prefetch=0,
            grid=grid,
            in_specs=in_specs,
            out_specs=pl.BlockSpec((tm, n_out_pad), lambda i: (i, 0)),
        ),
        compiler_params=pltpu.CompilerParams(
            dimension_semantics=("parallel",),
            vmem_limit_bytes=_VMEM_LIMIT_BYTES,
        ),
        cost_estimate=pl.CostEstimate(
            flops=flops, transcendentals=transc, bytes_accessed=bytes_acc),
    )(x_in, *ws, *bs)

    if n_out_pad != n_out:
        out = out[:, :n_out]
    return out


# ---------------------------------------------------------------------------
# Path 2: single large layer, M/N/K-tiled with an f32 VMEM accumulator
# ---------------------------------------------------------------------------
def _make_tiled_linear_kernel(activation):
    def kernel(x_ref, w_ref, b_ref, o_ref, acc_ref):
        k = pl.program_id(2)

        @pl.when(k == 0)
        def _():
            acc_ref[...] = jnp.zeros_like(acc_ref)

        acc_ref[...] += jnp.dot(x_ref[...], w_ref[...],
                                preferred_element_type=jnp.float32)

        @pl.when(k == pl.num_programs(2) - 1)
        def _():
            y = acc_ref[...] + b_ref[...]
            y = _apply_activation(y, activation)
            o_ref[...] = y.astype(o_ref.dtype)

    return kernel


def linear_pallas_tiled(x, w, b, activation=None, compute_dtype=jnp.bfloat16,
                        out_dtype=None, tile_m=1024, tile_n=1024, tile_k=None):
    """Fused linear + activation, tiled over M/N/K so weights never need to fit
    VMEM whole.  x: [M, K]  w: [K, N]  b: [N] -> [M, N].  K and N are padded to
    multiples of 128 with zeros (result sliced back)."""
    M, K = x.shape
    K2, N = w.shape
    assert K == K2, (K, K2)
    out_dtype = out_dtype or x.dtype
    compute_dtype = jnp.dtype(compute_dtype)
    act_bytes = compute_dtype.itemsize
    out_bytes = jnp.dtype(out_dtype).itemsize
    row_align = 16 if act_bytes < 4 else 8

    Kp = _round_up(K, _LANE)
    Np = _round_up(N, _LANE)

    x_in = x.astype(compute_dtype)
    if Kp != K:
        x_in = jnp.pad(x_in, ((0, 0), (0, Kp - K)))
    w_in = w.astype(compute_dtype)
    if Kp != K or Np != N:
        w_in = jnp.pad(w_in, ((0, Kp - K), (0, Np - N)))
    b2 = b.astype(jnp.float32)
    if Np != N:
        b2 = jnp.pad(b2, (0, Np - N))
    b2 = b2.reshape(1, Np)

    # Tile planning against the per-generation VMEM budget.  Big tiles amortize
    # the ~0.35 us per-step pipeline overhead; tm as large as possible because
    # the full [K, N] weight is re-streamed once per M tile.
    big_vmem = _VMEM_CAPACITY >= 100 * 1024 * 1024
    tk_pref = tile_k if tile_k is not None else (2048 if big_vmem else 1024)
    tn = _pick_tile_multiple(Np, tile_n)
    tk = _pick_tile_multiple(Kp, tk_pref)
    tm = min(tile_m, M)
    if tm < M:
        tm = max(row_align, (tm // row_align) * row_align)
    if _NUM_TC > 1 and M >= 2 * row_align and pl.cdiv(M, tm) < _NUM_TC:
        tm = min(tm, _round_up(pl.cdiv(M, _NUM_TC), row_align))
    tm = min(tm, M)

    def _vmem_use(tm_, tn_, tk_, wbufs=2):
        return (2 * tm_ * tk_ * act_bytes          # x tiles (double-buffered)
                + wbufs * tk_ * tn_ * act_bytes    # weight tiles
                + 2 * tm_ * tn_ * out_bytes        # output tiles
                + tm_ * tn_ * 4                    # f32 accumulator
                + 2 * tn_ * 4)                     # bias

    while _vmem_use(tm, tn, tk) > _VMEM_BUDGET_BYTES and tm > row_align:
        tm = max(row_align, tm // 2)
    while _vmem_use(tm, tn, tk) > _VMEM_BUDGET_BYTES and tk > _LANE:
        tk = _pick_tile_multiple(Kp, tk - _LANE)
    while _vmem_use(tm, tn, tk) > _VMEM_BUDGET_BYTES and tn > _LANE:
        tn = _pick_tile_multiple(Np, tn - _LANE)

    k_steps = Kp // tk
    # Triple-buffer the weight stream where VMEM is plentiful (v5e/v6e) and the
    # reduction actually has multiple steps to hide DMA latency across.
    weight_bufs = 3 if (big_vmem and k_steps >= 3 and
                        _vmem_use(tm, tn, tk, wbufs=3) <= _VMEM_BUDGET_BYTES) else 2

    grid = (pl.cdiv(M, tm), Np // tn, k_steps)

    bytes_acc = ((M * Kp + Kp * Np) * act_bytes + Np * 4
                 + M * Np * out_bytes)

    out = pl.pallas_call(
        _make_tiled_linear_kernel(activation),
        out_shape=jax.ShapeDtypeStruct((M, Np), out_dtype),
        grid_spec=pltpu.PrefetchScalarGridSpec(
            num_scalar_prefetch=0,
            grid=grid,
            in_specs=[
                pl.BlockSpec((tm, tk), lambda i, j, k: (i, k)),            # x
                _streamed_spec((tk, tn), lambda i, j, k: (k, j),
                               buffer_count=weight_bufs),                  # W
                pl.BlockSpec((1, tn), lambda i, j, k: (0, j)),             # b
            ],
            out_specs=pl.BlockSpec((tm, tn), lambda i, j, k: (i, j)),
            scratch_shapes=[pltpu.VMEM((tm, tn), jnp.float32)],
        ),
        compiler_params=pltpu.CompilerParams(
            dimension_semantics=("parallel", "parallel", "arbitrary"),
            vmem_limit_bytes=_VMEM_LIMIT_BYTES,
        ),
        cost_estimate=pl.CostEstimate(
            flops=2 * M * Np * Kp,
            transcendentals=0 if activation in (None, "relu") else M * Np,
            bytes_accessed=bytes_acc),
    )(x_in, w_in, b2)

    if Np != N:
        out = out[:, :N]
    return out


# ---------------------------------------------------------------------------
# Public forward + init
# ---------------------------------------------------------------------------
def init_mlp_params(key, input_size, output_size, hidden_sizes,
                    dtype=jnp.float32):
    """Deterministic init matching nn.Linear shapes (weights stored [in, out])."""
    sizes = [input_size] + list(hidden_sizes) + [output_size]
    params = []
    for in_size, out_size in zip(sizes[:-1], sizes[1:]):
        key, kw, kb = jax.random.split(key, 3)
        bound = 1.0 / (in_size ** 0.5)
        w = jax.random.uniform(kw, (in_size, out_size), dtype, -bound, bound)
        b = jax.random.uniform(kb, (out_size,), dtype, -bound, bound)
        params.append((w, b))
    return params


@functools.partial(jax.jit,
                   static_argnames=("activation", "compute_dtype", "force_pallas"))
def mlp_forward(x, params, activation="relu", compute_dtype=jnp.bfloat16,
                force_pallas=False):
    """MLP forward: hidden layers get `activation`, the final layer does not."""
    compute_dtype = jnp.dtype(compute_dtype)
    act_bytes = compute_dtype.itemsize
    M = x.shape[0]
    n_layers = len(params)

    widths = [x.shape[1]] + [w.shape[1] for (w, _) in params]
    flops = sum(2 * M * a * b for a, b in zip(widths[:-1], widths[1:]))

    # Tiny problems: launch + per-step pipeline overhead dominates -> plain XLA.
    if not force_pallas and (M < 16 or flops < (1 << 21)):
        return _mlp_reference(x, params, activation)

    widths_pad = [x.shape[1]] + [_round_up(n, _LANE) for n in widths[1:]]
    resident = sum(widths_pad[i] * widths_pad[i + 1] * act_bytes
                   + widths_pad[i + 1] * 4 for i in range(n_layers))

    if resident <= _WEIGHT_RESIDENT_BUDGET:
        # Small/medium MLP: one fused kernel, weights VMEM-resident; no HBM
        # round-trips and no lane-sparse stores for intermediate activations.
        return mlp_fused_pallas(x, params, activation=activation,
                                compute_dtype=compute_dtype, out_dtype=x.dtype)

    # Large layers: per-layer tiled matmul with a resident f32 accumulator.
    # Intermediate activations stay in compute_dtype (bf16) to halve HBM traffic.
    h = x
    for idx, (w, b) in enumerate(params):
        last = idx == n_layers - 1
        h = linear_pallas_tiled(
            h, w, b,
            activation=None if last else activation,
            compute_dtype=compute_dtype,
            out_dtype=x.dtype if last else compute_dtype)
    return h


if __name__ == "__main__":
    key = jax.random.PRNGKey(0)

    # MLP(input_size=64, output_size=24, hidden_sizes=[128, 96],
    #     activation='relu', dropout=0.0) — widths 96/24 exercise lane padding.
    input_size, output_size, hidden_sizes = 64, 24, [128, 96]
    batch = 128

    key, kx = jax.random.split(key)
    x = jax.random.normal(kx, (batch, input_size), dtype=jnp.float32)
    params = init_mlp_params(key, input_size, output_size, hidden_sizes)
    ref = _mlp_reference(x, params, "relu")

    # Fused Pallas path, default bf16 compute (f32 MXU accumulation).
    out_bf16 = mlp_forward(x, params, activation="relu", force_pallas=True)
    jax.block_until_ready(out_bf16)
    assert out_bf16.shape == (batch, output_size), out_bf16.shape
    assert out_bf16.dtype == jnp.float32, out_bf16.dtype
    assert jnp.allclose(out_bf16, ref, atol=1e-1, rtol=1e-1)

    # Fused Pallas path, f32 compute, tight tolerance.
    out_f32 = mlp_forward(x, params, activation="relu",
                          compute_dtype=jnp.float32, force_pallas=True)
    jax.block_until_ready(out_f32)
    assert jnp.allclose(out_f32, ref, atol=1e-5, rtol=1e-5)

    # Large-layer tiled path: multi-step K accumulation + N padding (384 -> ok,
    # tile_k=512 forces 4 accumulation steps).
    km, kk, kn = 512, 2048, 384
    k1, k2, k3 = jax.random.split(jax.random.PRNGKey(1), 3)
    xa = jax.random.normal(k1, (km, kk), dtype=jnp.float32)
    wa = jax.random.normal(k2, (kk, kn), dtype=jnp.float32) * 0.02
    ba = jax.random.normal(k3, (kn,), dtype=jnp.float32)
    ya = linear_pallas_tiled(xa, wa, ba, activation="relu",
                             compute_dtype=jnp.float32, tile_k=512)
    jax.block_until_ready(ya)
    ref_a = jnp.maximum(xa @ wa + ba, 0.0)
    assert ya.shape == (km, kn), ya.shape
    assert jnp.allclose(ya, ref_a, atol=2e-2, rtol=2e-2)

    # Tiny problem (the original demo config) dispatches to the XLA fallback.
    x_t = jax.random.normal(jax.random.PRNGKey(2), (8, 32), dtype=jnp.float32)
    params_t = init_mlp_params(jax.random.PRNGKey(3), 32, 16, [64, 32])
    out_t = mlp_forward(x_t, params_t, activation="relu")
    jax.block_until_ready(out_t)
    assert jnp.allclose(out_t, _mlp_reference(x_t, params_t, "relu"),
                        atol=1e-2, rtol=1e-2)

    print("KERNEL_OK")
</pallas_src>

<mosaic_0001>
module attributes {stable_mosaic.version = 11 : i64} {
  func.func @kernel(%arg0: i32, %arg1: memref<64x64xbf16, #tpu.memory_space<vmem>>, %arg2: memref<64x128xbf16, #tpu.memory_space<vmem>>, %arg3: memref<128x128xbf16, #tpu.memory_space<vmem>>, %arg4: memref<128x128xbf16, #tpu.memory_space<vmem>>, %arg5: memref<1x128xf32, #tpu.memory_space<vmem>>, %arg6: memref<1x128xf32, #tpu.memory_space<vmem>>, %arg7: memref<1x128xf32, #tpu.memory_space<vmem>>, %arg8: memref<64x128xf32, #tpu.memory_space<vmem>>) attributes {dimension_semantics = [#tpu.dimension_semantics<parallel>], iteration_bounds = array<i64: 2>, scalar_prefetch = 0 : i64, scratch_operands = 0 : i64, tpu.core_type = #tpu.core_type<tc>, window_params = [{transform_indices = @transform_0, window_bounds = array<i64: 64, 64>}, {pipeline_mode = #tpu.pipeline_mode<synchronous>, transform_indices = @transform_1, window_bounds = array<i64: 64, 128>}, {pipeline_mode = #tpu.pipeline_mode<synchronous>, transform_indices = @transform_2, window_bounds = array<i64: 128, 128>}, {pipeline_mode = #tpu.pipeline_mode<synchronous>, transform_indices = @transform_3, window_bounds = array<i64: 128, 128>}, {pipeline_mode = #tpu.pipeline_mode<synchronous>, transform_indices = @transform_4, window_bounds = array<i64: 1, 128>}, {pipeline_mode = #tpu.pipeline_mode<synchronous>, transform_indices = @transform_5, window_bounds = array<i64: 1, 128>}, {pipeline_mode = #tpu.pipeline_mode<synchronous>, transform_indices = @transform_6, window_bounds = array<i64: 1, 128>}, {transform_indices = @transform_7, window_bounds = array<i64: 64, 128>}]} {
    %c0 = arith.constant 0 : index
    %c0_0 = arith.constant 0 : index
    %0 = vector.load %arg1[%c0, %c0_0] : memref<64x64xbf16, #tpu.memory_space<vmem>>, vector<64x64xbf16>
    %c0_1 = arith.constant 0 : index
    %c0_2 = arith.constant 0 : index
    %1 = vector.load %arg2[%c0_1, %c0_2] : memref<64x128xbf16, #tpu.memory_space<vmem>>, vector<64x128xbf16>
    %cst = arith.constant dense<0.000000e+00> : vector<64x128xf32>
    %2 = tpu.matmul %0, %1, %cst {dimension_numbers = #tpu.dot_dimension_numbers<[1], [0], [0], [1], [0, 0, 1, 1], [], []>} : vector<64x64xbf16>, vector<64x128xbf16>, vector<64x128xf32> -> vector<64x128xf32>
    %c0_3 = arith.constant 0 : index
    %c0_4 = arith.constant 0 : index
    %3 = vector.load %arg5[%c0_3, %c0_4] : memref<1x128xf32, #tpu.memory_space<vmem>>, vector<1x128xf32>
    %4 = vector.broadcast %3 : vector<1x128xf32> to vector<64x128xf32>
    %5 = arith.addf %2, %4 : vector<64x128xf32>
    %cst_5 = arith.constant 0.000000e+00 : f32
    %6 = vector.broadcast %cst_5 : f32 to vector<64x128xf32>
    %7 = arith.maximumf %5, %6 : vector<64x128xf32>
    %8 = arith.truncf %7 : vector<64x128xf32> to vector<64x128xbf16>
    %c0_6 = arith.constant 0 : index
    %c0_7 = arith.constant 0 : index
    %9 = vector.load %arg3[%c0_6, %c0_7] : memref<128x128xbf16, #tpu.memory_space<vmem>>, vector<128x128xbf16>
    %cst_8 = arith.constant dense<0.000000e+00> : vector<64x128xf32>
    %10 = tpu.matmul %8, %9, %cst_8 {dimension_numbers = #tpu.dot_dimension_numbers<[1], [0], [0], [1], [0, 0, 1, 1], [], []>} : vector<64x128xbf16>, vector<128x128xbf16>, vector<64x128xf32> -> vector<64x128xf32>
    %c0_9 = arith.constant 0 : index
    %c0_10 = arith.constant 0 : index
    %11 = vector.load %arg6[%c0_9, %c0_10] : memref<1x128xf32, #tpu.memory_space<vmem>>, vector<1x128xf32>
    %12 = vector.broadcast %11 : vector<1x128xf32> to vector<64x128xf32>
    %13 = arith.addf %10, %12 : vector<64x128xf32>
    %cst_11 = arith.constant 0.000000e+00 : f32
    %14 = vector.broadcast %cst_11 : f32 to vector<64x128xf32>
    %15 = arith.maximumf %13, %14 : vector<64x128xf32>
    %16 = arith.truncf %15 : vector<64x128xf32> to vector<64x128xbf16>
    %c0_12 = arith.constant 0 : index
    %c0_13 = arith.constant 0 : index
    %17 = vector.load %arg4[%c0_12, %c0_13] : memref<128x128xbf16, #tpu.memory_space<vmem>>, vector<128x128xbf16>
    %cst_14 = arith.constant dense<0.000000e+00> : vector<64x128xf32>
    %18 = tpu.matmul %16, %17, %cst_14 {dimension_numbers = #tpu.dot_dimension_numbers<[1], [0], [0], [1], [0, 0, 1, 1], [], []>} : vector<64x128xbf16>, vector<128x128xbf16>, vector<64x128xf32> -> vector<64x128xf32>
    %c0_15 = arith.constant 0 : index
    %c0_16 = arith.constant 0 : index
    %19 = vector.load %arg7[%c0_15, %c0_16] : memref<1x128xf32, #tpu.memory_space<vmem>>, vector<1x128xf32>
    %20 = vector.broadcast %19 : vector<1x128xf32> to vector<64x128xf32>
    %21 = arith.addf %18, %20 : vector<64x128xf32>
    %c0_17 = arith.constant 0 : index
    %c0_18 = arith.constant 0 : index
    %22 = vector.load %arg8[%c0_17, %c0_18] : memref<64x128xf32, #tpu.memory_space<vmem>>, vector<64x128xf32>
    tpu.vector_store %arg8[%c0_17, %c0_18], %21 {strides = array<i32>} : memref<64x128xf32, #tpu.memory_space<vmem>>, vector<64x128xf32>,
    return
  }
  func.func @transform_0(%arg0: i32) -> (i32, i32) {
    %c0_i32 = arith.constant 0 : i32
    %c0_i32_0 = arith.constant 0 : i32
    return %arg0, %c0_i32 : i32, i32
  }
  func.func @transform_1(%arg0: i32) -> (i32, i32) {
    %c0_i32 = arith.constant 0 : i32
    %c0_i32_0 = arith.constant 0 : i32
    %c0_i32_1 = arith.constant 0 : i32
    return %c0_i32, %c0_i32_0 : i32, i32
  }
  func.func @transform_2(%arg0: i32) -> (i32, i32) {
    %c0_i32 = arith.constant 0 : i32
    %c0_i32_0 = arith.constant 0 : i32
    %c0_i32_1 = arith.constant 0 : i32
    return %c0_i32, %c0_i32_0 : i32, i32
  }
  func.func @transform_3(%arg0: i32) -> (i32, i32) {
    %c0_i32 = arith.constant 0 : i32
    %c0_i32_0 = arith.constant 0 : i32
    %c0_i32_1 = arith.constant 0 : i32
    return %c0_i32, %c0_i32_0 : i32, i32
  }
  func.func @transform_4(%arg0: i32) -> (i32, i32) {
    %c0_i32 = arith.constant 0 : i32
    %c0_i32_0 = arith.constant 0 : i32
    %c0_i32_1 = arith.constant 0 : i32
    return %c0_i32, %c0_i32_0 : i32, i32
  }
  func.func @transform_5(%arg0: i32) -> (i32, i32) {
    %c0_i32 = arith.constant 0 : i32
    %c0_i32_0 = arith.constant 0 : i32
    %c0_i32_1 = arith.constant 0 : i32
    return %c0_i32, %c0_i32_0 : i32, i32
  }
  func.func @transform_6(%arg0: i32) -> (i32, i32) {
    %c0_i32 = arith.constant 0 : i32
    %c0_i32_0 = arith.constant 0 : i32
    %c0_i32_1 = arith.constant 0 : i32
    return %c0_i32, %c0_i32_0 : i32, i32
  }
  func.func @transform_7(%arg0: i32) -> (i32, i32) {
    %c0_i32 = arith.constant 0 : i32
    %c0_i32_0 = arith.constant 0 : i32
    return %arg0, %c0_i32 : i32, i32
  }
}

</mosaic_0001>

<bundles_post_ra>
// kernel: mlp_forward.1
= control target key start
LH: loop header
LB: loop body
LE: loop exit
PB: predicated region body
PF: predicated region fallthrough
CT: control target
= control target key end

     0   :  { %s881_s24 = smov 0   ;;  %s975_s0 = inlined_call_operand.vmem [shape: bf16[128,64], index: 0, kind: input, shape index: {}]   ;;  %s976_s1 = inlined_call_operand.vmem [shape: bf16[64,128], index: 1, kind: input, shape index: {}]   ;;  %s977_s2 = inlined_call_operand.vmem [shape: bf16[128,128], index: 2, kind: input, shape index: {}]   ;;  %s978_s3 = inlined_call_operand.vmem [shape: bf16[128,128], index: 3, kind: input, shape index: {}]   ;;  %s979_s4 = inlined_call_operand.vmem [shape: f32[1,128], index: 4, kind: input, shape index: {}]   ;;  %s980_s5 = inlined_call_operand.vmem [shape: f32[1,128], index: 5, kind: input, shape index: {}]   ;;  %s981_s6 = inlined_call_operand.vmem [shape: f32[1,128], index: 6, kind: input, shape index: {}]   ;;  %s982_s7 = inlined_call_operand.vmem [shape: f32[128,128], index: 7, kind: output, shape index: {}]  }
   0x1 LB: > { %s671_s25 = sadd.s32 4294967295, %s839_s24   ;;  %p675_p0 = scmp.ge.s32.totalorder %s839_s24, 1  ;;  %s839_s24 = sphi %s881_s24, %s17_s24  }
   0x2   : > { %p238_p1 = scmp.lt.s32.totalorder %s839_s24, 3 }
   0x4   : > { %p239_p2 = pnand %p675_p0, %p238_p1 }
   0x5   : > { %s676_s28 = sshll.u32 (!%p239_p2), %s671_s25, 3 }
   0x6   : > { %242 = sbr.rel (%p239_p2) target bundleno = 504 (0x1f8), region = 48  ;;  %p271_p3 = scmp.lt.s32.totalorder (!%p239_p2), %s676_s28, 15 }
   0xb   : > { %v789_v0 = vld [vmem:[%s976_s1 + $0x18] sm:$0xff]  ;;  %v788_v1 = vld [vmem:[%s976_s1 + $0x10] sm:$0xff]  ;;  %s984_s28 = smov (!%p271_p3, %s676_s28), 15  ;;  %v787_v2 = vld [vmem:[%s976_s1 + $0x8] sm:$0xff]  ;;  %vm347_vm0 = vcmask 523264  }
   0xc   : > { %364 = vmatpush.bf16.msra.mxu0 %v789_v0  ;;  %s677_s10 = sshll.u32 %s984_s28, 2  ;;  %v786_v3 = vld [vmem:[%s976_s1] sm:$0xff]  ;;  %v797_v6 = vld [vmem:[%s977_s2 + $0x38] sm:$0xff]  ;;  %v796_v7 = vld [vmem:[%s977_s2 + $0x30] sm:$0xff] }
   0xd   : > { %s274_s15 = scalar_lea.vmem %s975_s0, %s677_s10  ;;  %469 = vmatpush.bf16.msra.mxu1 %v797_v6  ;;  %806 = vmatpush.bf16.msra.mxu3 %v797_v6  ;;  %v795_v8 = vld [vmem:[%s977_s2 + $0x28] sm:$0xff]  ;;  %v794_v9 = vld [vmem:[%s977_s2 + $0x20] sm:$0xff]  ;;  %v793_v12 = vld [vmem:[%s977_s2 + $0x18] sm:$0xff]  ;;  %s679_s10 = sshll.u32 %s984_s28, 3 }
   0xe   : > { %v782_v4 = vld [vmem:[%s274_s15] sm:$0xff]  ;;  %v783_v5 = vld [vmem:[%s274_s15 + $0x8] sm:$0xff]  ;;  %v784_v10 = vld [vmem:[%s274_s15 + $0x10] sm:$0xff] }
   0xf   : > { %v785_v11 = vld [vmem:[%s274_s15 + $0x18] sm:$0xff]  ;;  %v792_v13 = vld [vmem:[%s977_s2 + $0x10] sm:$0xff]  ;;  %v791_v14 = vld [vmem:[%s977_s2 + $0x8] sm:$0xff]  ;;  %s280_s15 = scalar_lea.vmem %s982_s7, %s679_s10 }
  0x10   : > { %365 = vmatpush.bf16.msra.mxu0 %v788_v1  ;;  %v790_v15 = vld [vmem:[%s977_s2] sm:$0xff]  ;;  %v805_v31 = vld [vmem:[%s978_s3 + $0x38] sm:$0xff]  ;;  %v804_v33 = vld [vmem:[%s978_s3 + $0x30] sm:$0xff] }
  0x11   : > { %470 = vmatpush.bf16.msra.mxu1 %v796_v7  ;;  %807 = vmatpush.bf16.msra.mxu3 %v796_v7  ;;  %v830_v17 = vld [vmem:[%s979_s4] ss:$0 sm:$0xff]  ;;  %v803_v34 = vld [vmem:[%s978_s3 + $0x28] sm:$0xff]  ;;  %v801_v49 = vld [vmem:[%s978_s3 + $0x18] sm:$0xff] }
  0x12   : > { %814 = vmatpush.bf16.msra.mxu2 %v805_v31  ;;  %v802_v38 = vld [vmem:[%s978_s3 + $0x20] sm:$0xff]  ;;  %v800_v50 = vld [vmem:[%s978_s3 + $0x10] sm:$0xff]  ;;  %v799_v51 = vld [vmem:[%s978_s3 + $0x8] sm:$0xff] }
  0x13   : > { %v798_v52 = vld [vmem:[%s978_s3] sm:$0xff] }
  0x14   : > { %366 = vmatpush.bf16.msra.mxu0 %v787_v2  ;;  %v831_v54 = vld [vmem:[%s980_s5] ss:$0 sm:$0xff] }
  0x15   : > { %471 = vmatpush.bf16.msra.mxu1 %v795_v8  ;;  %808 = vmatpush.bf16.msra.mxu3 %v795_v8 }
  0x16   : > { %815 = vmatpush.bf16.msra.mxu2 %v804_v33 }
  0x18   : > { %367 = vmatpush.bf16.msra.mxu0 %v786_v3 }
  0x19   : > { %472 = vmatpush.bf16.msra.mxu1 %v794_v9  ;;  %809 = vmatpush.bf16.msra.mxu3 %v794_v9 }
  0x1a   : > { %816 = vmatpush.bf16.msra.mxu2 %v803_v34 }
  0x1b   : > { %712 = vmatmul.msk.bf16.vlgmr.msra.gmra.mxu0 %vm347_vm0, %v782_v4 }
  0x1d   : > { %473 = vmatpush.bf16.msra.mxu1 %v793_v12  ;;  %810 = vmatpush.bf16.msra.mxu3 %v793_v12 }
  0x1e   : > { %817 = vmatpush.bf16.msra.mxu2 %v802_v38 }
  0x21   : > { %474 = vmatpush.bf16.msra.mxu1 %v792_v13  ;;  %811 = vmatpush.bf16.msra.mxu3 %v792_v13 }
  0x22   : > { %818 = vmatpush.bf16.msra.mxu2 %v801_v49 }
  0x25   : > { %475 = vmatpush.bf16.msra.mxu1 %v791_v14  ;;  %812 = vmatpush.bf16.msra.mxu3 %v791_v14 }
  0x26   : > { %819 = vmatpush.bf16.msra.mxu2 %v800_v50 }
  0x29   : > { %476 = vmatpush.bf16.msra.mxu1 %v790_v15  ;;  %813 = vmatpush.bf16.msra.mxu3 %v790_v15 }
  0x2a   : > { %820 = vmatpush.bf16.msra.mxu2 %v799_v51 }
  0x2b   : > { %713 = vmatmul.msk.bf16.gmra.mxu0 %vm347_vm0, %v783_v5 }
  0x2d   : > { %578 = vmatpush.bf16.msrb.mxu1 %v805_v31 }
  0x2e   : > { %821 = vmatpush.bf16.msra.mxu2 %v798_v52 }
  0x31   : > { %579 = vmatpush.bf16.msrb.mxu1 %v804_v33 }
  0x35   : > { %580 = vmatpush.bf16.msrb.mxu1 %v803_v34 }
  0x39   : > { %581 = vmatpush.bf16.msrb.mxu1 %v802_v38 }
  0x3b   : > { %714 = vmatmul.msk.bf16.gmra.mxu0 %vm347_vm0, %v784_v10 }
  0x3d   : > { %582 = vmatpush.bf16.msrb.mxu1 %v801_v49 }
  0x41   : > { %583 = vmatpush.bf16.msrb.mxu1 %v800_v50 }
  0x45   : > { %584 = vmatpush.bf16.msrb.mxu1 %v799_v51 }
  0x49   : > { %585 = vmatpush.bf16.msrb.mxu1 %v798_v52 }
  0x4b   : > { %715 = vmatmul.msk.bf16.gmra.mxu0 %vm347_vm0, %v785_v11 }
  0x98   : > { %v369_v16 = vpop.f32.mrf.mxu0 }
  0x99   : > { %v370_v18 = vadd.f32 %v830_v17, %v369_v16 }
  0x9b   : > { %v389_v21 = vmax.f32 %v370_v18, 0.0  ;;  %v832_v18 = vld [vmem:[%s981_s6] ss:$0 sm:$0xff] }
  0xa0   : > { %v371_v19 = vpop.f32.mrf.mxu0 }
  0xa1   : > { %v372_v20 = vadd.f32 %v830_v17, %v371_v19 }
  0xa3   : > { %v390_v22 = vmax.f32 %v372_v20, 0.0 }
  0xa5   : > { %v397_v23 = vpack.c.bf16 %v390_v22, %v389_v21 }
  0xa7   : > { %477 = vmatmul.bf16.vlgmr.msra.gmra.mxu1 %v397_v23 }
  0xa8   : > { %v374_v24 = vpop.f32.mrf.mxu0 }
  0xa9   : > { %v375_v25 = vadd.f32 %v830_v17, %v374_v24 }
  0xab   : > { %v391_v28 = vmax.f32 %v375_v25, 0.0 }
  0xb0   : > { %v376_v26 = vpop.f32.mrf.mxu0 }
  0xb1   : > { %v377_v27 = vadd.f32 %v830_v17, %v376_v26 }
  0xb3   : > { %v392_v29 = vmax.f32 %v377_v27, 0.0 }
  0xb5   : > { %v398_v30 = vpack.c.bf16 %v392_v29, %v391_v28 }
  0xb7   : > { %482 = vmatmul.bf16.vlgmr.msra.gmra.mxu3 %v398_v30 }
  0xb8   : > { %v379_v32 = vpop.f32.mrf.mxu0 }
  0xb9   : > { %v380_v35 = vadd.f32 %v830_v17, %v379_v32 }
  0xbb   : > { %v393_v39 = vmax.f32 %v380_v35, 0.0 }
  0xc0   : > { %v381_v36 = vpop.f32.mrf.mxu0 }
  0xc1   : > { %v382_v37 = vadd.f32 %v830_v17, %v381_v36 }
  0xc3   : > { %v394_v40 = vmax.f32 %v382_v37, 0.0 }
  0xc5   : > { %v399_v41 = vpack.c.bf16 %v394_v40, %v393_v39 }
  0xc7   : > { %487 = vmatmul.bf16.gmra.mxu3 %v399_v41 }
  0xc8   : > { %v384_v42 = vpop.f32.mrf.mxu0 }
  0xc9   : > { %v385_v43 = vadd.f32 %v830_v17, %v384_v42 }
  0xcb   : > { %v395_v46 = vmax.f32 %v385_v43, 0.0 }
  0xd0   : > { %v386_v44 = vpop.f32.mrf.mxu0 }
  0xd1   : > { %v387_v45 = vadd.f32 %v830_v17, %v386_v44 }
  0xd3   : > { %v396_v47 = vmax.f32 %v387_v45, 0.0 }
  0xd5   : > { %v400_v48 = vpack.c.bf16 %v396_v47, %v395_v46 }
  0xd7   : > { %492 = vmatmul.bf16.gmra.mxu3 %v400_v48 }
 0x124   : > { %v478_v53 = vpop.f32.mrf.mxu1 }
 0x125   : > { %v479_v55 = vadd.f32 %v831_v54, %v478_v53 }
 0x127   : > { %v498_v58 = vmax.f32 %v479_v55, 0.0 }
 0x12c   : > { %v480_v56 = vpop.f32.mrf.mxu1 }
 0x12d   : > { %v481_v57 = vadd.f32 %v831_v54, %v480_v56 }
 0x12f   : > { %v499_v59 = vmax.f32 %v481_v57, 0.0 }
 0x131   : > { %v506_v60 = vpack.c.bf16 %v499_v59, %v498_v58 }
 0x133   : > { %586 = vmatmul.bf16.vlgmr.msrb.gmra.mxu1 %v506_v60 }
 0x13a   : > { %v483_v61 = vpop.f32.mrf.mxu3 }
 0x13b   : > { %v484_v62 = vadd.f32 %v831_v54, %v483_v61 }
 0x13d   : > { %v500_v1 = vmax.f32 %v484_v62, 0.0 }
 0x142   : > { %v485_v63 = vpop.f32.mrf.mxu3 }
 0x143   : > { %v486_v0 = vadd.f32 %v831_v54, %v485_v63 }
 0x145   : > { %v501_v2 = vmax.f32 %v486_v0, 0.0 }
 0x147   : > { %v507_v3 = vpack.c.bf16 %v501_v2, %v500_v1 }
 0x149   : > { %591 = vmatmul.bf16.vlgmr.msra.gmra.mxu2 %v507_v3 }
 0x14a   : > { %v488_v4 = vpop.f32.mrf.mxu3 }
 0x14b   : > { %v489_v5 = vadd.f32 %v831_v54, %v488_v4 }
 0x14d   : > { %v502_v8 = vmax.f32 %v489_v5, 0.0 }
 0x152   : > { %v490_v6 = vpop.f32.mrf.mxu3 }
 0x153   : > { %v491_v7 = vadd.f32 %v831_v54, %v490_v6 }
 0x155   : > { %v503_v9 = vmax.f32 %v491_v7, 0.0 }
 0x157   : > { %v508_v10 = vpack.c.bf16 %v503_v9, %v502_v8 }
 0x159   : > { %596 = vmatmul.bf16.gmra.mxu2 %v508_v10 }
 0x15a   : > { %v493_v11 = vpop.f32.mrf.mxu3 }
 0x15b   : > { %v494_v12 = vadd.f32 %v831_v54, %v493_v11 }
 0x15d   : > { %v504_v15 = vmax.f32 %v494_v12, 0.0 }
 0x162   : > { %v495_v13 = vpop.f32.mrf.mxu3 }
 0x163   : > { %v496_v14 = vadd.f32 %v831_v54, %v495_v13 }
 0x165   : > { %v505_v16 = vmax.f32 %v496_v14, 0.0 }
 0x167   : > { %v509_v17 = vpack.c.bf16 %v505_v16, %v504_v15 }
 0x169   : > { %601 = vmatmul.bf16.gmra.mxu2 %v509_v17 }
 0x1b0   : > { %v587_v19 = vpop.f32.mrf.mxu1 }
 0x1b1   : > { %v588_v20 = vadd.f32 %v832_v18, %v587_v19 }
 0x1b3   : > { %607 = vst [vmem:[%s280_s15] sm:$0xff] %v588_v20 }
 0x1b8   : > { %v589_v21 = vpop.f32.mrf.mxu1 }
 0x1b9   : > { %v590_v22 = vadd.f32 %v832_v18, %v589_v21 }
 0x1bb   : > { %608 = vst [vmem:[%s280_s15 + $0x8] sm:$0xff] %v590_v22 }
 0x1cc   : > { %v592_v23 = vpop.f32.mrf.mxu2 }
 0x1cd   : > { %v593_v24 = vadd.f32 %v832_v18, %v592_v23 }
 0x1cf   : > { %609 = vst [vmem:[%s280_s15 + $0x10] sm:$0xff] %v593_v24 }
 0x1d4   : > { %v594_v25 = vpop.f32.mrf.mxu2 }
 0x1d5   : > { %v595_v26 = vadd.f32 %v832_v18, %v594_v25 }
 0x1d7   : > { %610 = vst [vmem:[%s280_s15 + $0x18] sm:$0xff] %v595_v26 }
 0x1dc   : > { %v597_v27 = vpop.f32.mrf.mxu2 }
 0x1dd   : > { %v598_v28 = vadd.f32 %v832_v18, %v597_v27 }
 0x1df   : > { %611 = vst [vmem:[%s280_s15 + $0x20] sm:$0xff] %v598_v28 }
 0x1e4   : > { %v599_v29 = vpop.f32.mrf.mxu2 }
 0x1e5   : > { %v600_v30 = vadd.f32 %v832_v18, %v599_v29 }
 0x1e7   : > { %612 = vst [vmem:[%s280_s15 + $0x28] sm:$0xff] %v600_v30 }
 0x1ec   : > { %v602_v31 = vpop.f32.mrf.mxu2 }
 0x1ed   : > { %v603_v32 = vadd.f32 %v832_v18, %v602_v31 }
 0x1ef   : > { %613 = vst [vmem:[%s280_s15 + $0x30] sm:$0xff] %v603_v32 }
 0x1f4   : > { %v604_v33 = vpop.f32.mrf.mxu2 }
 0x1f5   : > { %v605_v34 = vadd.f32 %v832_v18, %v604_v33 }
 0x1f7   : > { %614 = vst [vmem:[%s280_s15 + $0x38] sm:$0xff] %v605_v34 }
 0x1f8 PF: > { %s17_s24 = sadd.s32 1, %s839_s24  }
 0x1f9   : > { %p14_p4 = scmp.ge.s32.totalorder %s17_s24, 4  }
 0x1fb   :  { %16 = sbr.rel (!%p14_p4) target bundleno = 1 (0x1), region = 78 }

</bundles_post_ra>
